<compile_context>
chip_gen: v7x
topology: tpu7x:2x2x1
jax: 0.10.0
libtpu: 0.0.40
codegen_flags: <defaults>
</compile_context>

<pallas_src>
import jax
import jax.numpy as jnp
from jax.experimental import pallas as pl
from jax.experimental.pallas import tpu as pltpu

_LANE = 128
_SUBLANE = 8


def _round_up(n, m):
    return ((n + m - 1) // m) * m


def _dqn_kernel(x_ref,
                w0_ref, b0_ref,
                w1_ref, b1_ref,
                w2_ref, b2_ref,
                w3_ref, b3_ref,
                w4_ref, b4_ref,
                out_ref):
    """One batch tile: 5 matmuls (bf16 in, f32 acc), bias adds, 4 ReLUs."""

    def dense(h, w_ref, b_ref):
        # bf16 x bf16 -> f32 accumulation on the MXU; bias add in f32.
        return jnp.dot(h.astype(w_ref.dtype), w_ref[...],
                       preferred_element_type=jnp.float32) + b_ref[...]

    h = x_ref[...]                                    # bf16 input tile
    h = jnp.maximum(dense(h, w0_ref, b0_ref), 0.0)    # inputLayer  + ReLU
    h = jnp.maximum(dense(h, w1_ref, b1_ref), 0.0)    # layer1      + ReLU
    h = jnp.maximum(dense(h, w2_ref, b2_ref), 0.0)    # layer2      + ReLU
    h = jnp.maximum(dense(h, w3_ref, b3_ref), 0.0)    # layer3      + ReLU
    h = dense(h, w4_ref, b4_ref)                      # outputLayer (no act)

    out_ref[...] = h.astype(out_ref.dtype)


def dqn_forward(x, params, *, block_batch=512, compute_dtype=jnp.bfloat16):
    """params: list of (W[in,out], b[1,out]) f32 tuples for the 5 linear layers.

    Pads all feature dims to multiples of 128 (with zeros), casts weights and
    input to `compute_dtype`, tiles the (padded) batch over a "parallel" grid
    and keeps all layer weights resident in VMEM.  Returns f32
    (batch, action_size).
    """
    batch, obs = x.shape
    action_size = params[-1][0].shape[1]

    # --- pad + cast parameters (zero rows/cols/bias keep padded lanes at 0).
    padded_params = []
    padded_dims = []
    for w, b in params:
        fi, fo = w.shape
        fip, fop = _round_up(fi, _LANE), _round_up(fo, _LANE)
        wp = jnp.zeros((fip, fop), compute_dtype).at[:fi, :fo].set(
            w.astype(compute_dtype))
        bp = jnp.zeros((1, fop), jnp.float32).at[:, :fo].set(
            b.reshape(1, -1).astype(jnp.float32))
        padded_params.append((wp, bp))
        padded_dims.append((fip, fop))

    obs_p = padded_dims[0][0]
    act_p = padded_dims[-1][1]

    # --- batch tiling: tile size is a multiple of 8 sublanes, capped at
    #     block_batch; the batch itself is padded to a whole number of tiles.
    tb = max(_SUBLANE, min(_round_up(block_batch, _SUBLANE),
                           _round_up(batch, _SUBLANE)))
    nb = pl.cdiv(batch, tb)
    batch_p = nb * tb

    xp = jnp.zeros((batch_p, obs_p), compute_dtype).at[:batch, :obs].set(
        x.astype(compute_dtype))

    # --- specs: x / out tiled over batch; weights/biases resident (const map).
    flat_params = []
    in_specs = [pl.BlockSpec((tb, obs_p), lambda i: (i, 0))]
    for (wp, bp), (fip, fop) in zip(padded_params, padded_dims):
        flat_params.append(wp)
        flat_params.append(bp)
        in_specs.append(pl.BlockSpec((fip, fop), lambda i: (0, 0)))
        in_specs.append(pl.BlockSpec((1, fop), lambda i: (0, 0)))
    out_spec = pl.BlockSpec((tb, act_p), lambda i: (i, 0))

    # --- cost estimate (helps XLA overlap the custom call with neighbours).
    flops = 2 * batch_p * sum(fip * fop for fip, fop in padded_dims)
    param_bytes = sum(int(wp.size) * wp.dtype.itemsize + int(bp.size) * 4
                      for wp, bp in padded_params)
    in_bytes = int(xp.size) * xp.dtype.itemsize
    out_bytes = batch_p * act_p * 4
    cost = pl.CostEstimate(flops=flops, transcendentals=0,
                           bytes_accessed=in_bytes + param_bytes + out_bytes)

    # --- explicit VMEM budget: resident params + double-buffered io tiles
    #     + headroom for intermediate activations.  Stays under v7x's 64 MiB.
    max_dp = max(max(fip, fop) for fip, fop in padded_dims)
    vmem_limit = (2 * param_bytes
                  + 2 * (tb * obs_p * xp.dtype.itemsize + tb * act_p * 4)
                  + 8 * tb * max_dp * 4
                  + (4 << 20))
    vmem_limit = int(min(max(vmem_limit, 32 << 20), 56 << 20))

    out = pl.pallas_call(
        _dqn_kernel,
        out_shape=jax.ShapeDtypeStruct((batch_p, act_p), jnp.float32),
        grid=(nb,),
        in_specs=in_specs,
        out_specs=out_spec,
        compiler_params=pltpu.CompilerParams(
            dimension_semantics=("parallel",),
            vmem_limit_bytes=vmem_limit),
        cost_estimate=cost,
    )(xp, *flat_params)

    return out[:batch, :action_size]


def init_dqn_params(key, observation_size, action_size):
    """Deterministic init mirroring nn.Linear shapes (uniform +-1/sqrt(fan_in))."""
    dims = [
        (observation_size * 1, observation_size * 2),  # inputLayer
        (observation_size * 2, observation_size * 4),  # layer1
        (observation_size * 4, observation_size * 2),  # layer2
        (observation_size * 2, observation_size * 1),  # layer3
        (observation_size * 1, action_size),           # outputLayer
    ]
    params = []
    for (fan_in, fan_out) in dims:
        key, kw, kb = jax.random.split(key, 3)
        bound = 1.0 / jnp.sqrt(jnp.float32(fan_in))
        w = jax.random.uniform(kw, (fan_in, fan_out), jnp.float32, -bound, bound)
        b = jax.random.uniform(kb, (1, fan_out), jnp.float32, -bound, bound)
        params.append((w, b))
    return params


def dqn_reference(x, params, compute_dtype=jnp.float32):
    """Pure-JAX reference of the same forward pass (optionally bf16 matmuls)."""
    h = x.astype(jnp.float32)
    for i, (w, b) in enumerate(params):
        h = jnp.dot(h.astype(compute_dtype), w.astype(compute_dtype),
                    preferred_element_type=jnp.float32) + b.astype(jnp.float32)
        if i < len(params) - 1:
            h = jnp.maximum(h, 0.0)
    return h


if __name__ == "__main__":
    observation_size = 16
    action_size = 4
    batch = 8

    key = jax.random.PRNGKey(0)
    key, kx = jax.random.split(key)

    x = jax.random.normal(kx, (batch, observation_size), jnp.float32)
    params = init_dqn_params(key, observation_size, action_size)

    out = jax.block_until_ready(dqn_forward(x, params))
    assert out.shape == (batch, action_size), out.shape

    # Exact-path check: reference using the same bf16-input / f32-accum matmuls.
    ref_bf16 = dqn_reference(x, params, compute_dtype=jnp.bfloat16)
    assert jnp.allclose(out, ref_bf16, atol=2e-3, rtol=2e-3), (
        float(jnp.max(jnp.abs(out - ref_bf16))))

    # Sanity check against the pure f32 forward pass (bf16 rounding tolerance).
    ref_f32 = dqn_reference(x, params, compute_dtype=jnp.float32)
    assert jnp.allclose(out, ref_f32, atol=5e-2, rtol=5e-2), (
        float(jnp.max(jnp.abs(out - ref_f32))))

    print("KERNEL_OK")
</pallas_src>

<mosaic_0001>
module attributes {stable_mosaic.version = 11 : i64} {
  func.func @_dqn_kernel(%arg0: i32, %arg1: memref<8x128xbf16, #tpu.memory_space<vmem>>, %arg2: memref<128x128xbf16, #tpu.memory_space<vmem>>, %arg3: memref<1x128xf32, #tpu.memory_space<vmem>>, %arg4: memref<128x128xbf16, #tpu.memory_space<vmem>>, %arg5: memref<1x128xf32, #tpu.memory_space<vmem>>, %arg6: memref<128x128xbf16, #tpu.memory_space<vmem>>, %arg7: memref<1x128xf32, #tpu.memory_space<vmem>>, %arg8: memref<128x128xbf16, #tpu.memory_space<vmem>>, %arg9: memref<1x128xf32, #tpu.memory_space<vmem>>, %arg10: memref<128x128xbf16, #tpu.memory_space<vmem>>, %arg11: memref<1x128xf32, #tpu.memory_space<vmem>>, %arg12: memref<8x128xf32, #tpu.memory_space<vmem>>) attributes {dimension_semantics = [#tpu.dimension_semantics<parallel>], iteration_bounds = array<i64: 1>, scalar_prefetch = 0 : i64, scratch_operands = 0 : i64, tpu.core_type = #tpu.core_type<tc>, window_params = [{transform_indices = @transform_0, window_bounds = array<i64: 8, 128>}, {pipeline_mode = #tpu.pipeline_mode<synchronous>, transform_indices = @transform_1, window_bounds = array<i64: 128, 128>}, {pipeline_mode = #tpu.pipeline_mode<synchronous>, transform_indices = @transform_2, window_bounds = array<i64: 1, 128>}, {pipeline_mode = #tpu.pipeline_mode<synchronous>, transform_indices = @transform_3, window_bounds = array<i64: 128, 128>}, {pipeline_mode = #tpu.pipeline_mode<synchronous>, transform_indices = @transform_4, window_bounds = array<i64: 1, 128>}, {pipeline_mode = #tpu.pipeline_mode<synchronous>, transform_indices = @transform_5, window_bounds = array<i64: 128, 128>}, {pipeline_mode = #tpu.pipeline_mode<synchronous>, transform_indices = @transform_6, window_bounds = array<i64: 1, 128>}, {pipeline_mode = #tpu.pipeline_mode<synchronous>, transform_indices = @transform_7, window_bounds = array<i64: 128, 128>}, {pipeline_mode = #tpu.pipeline_mode<synchronous>, transform_indices = @transform_8, window_bounds = array<i64: 1, 128>}, {pipeline_mode = #tpu.pipeline_mode<synchronous>, transform_indices = @transform_9, window_bounds = array<i64: 128, 128>}, {pipeline_mode = #tpu.pipeline_mode<synchronous>, transform_indices = @transform_10, window_bounds = array<i64: 1, 128>}, {transform_indices = @transform_11, window_bounds = array<i64: 8, 128>}]} {
    %c0 = arith.constant 0 : index
    %c0_0 = arith.constant 0 : index
    %0 = vector.load %arg1[%c0, %c0_0] : memref<8x128xbf16, #tpu.memory_space<vmem>>, vector<8x128xbf16>
    %c0_1 = arith.constant 0 : index
    %c0_2 = arith.constant 0 : index
    %1 = vector.load %arg2[%c0_1, %c0_2] : memref<128x128xbf16, #tpu.memory_space<vmem>>, vector<128x128xbf16>
    %cst = arith.constant dense<0.000000e+00> : vector<8x128xf32>
    %2 = tpu.matmul %0, %1, %cst {dimension_numbers = #tpu.dot_dimension_numbers<[1], [0], [0], [1], [0, 0, 1, 1], [], []>} : vector<8x128xbf16>, vector<128x128xbf16>, vector<8x128xf32> -> vector<8x128xf32>
    %c0_3 = arith.constant 0 : index
    %c0_4 = arith.constant 0 : index
    %3 = vector.load %arg3[%c0_3, %c0_4] : memref<1x128xf32, #tpu.memory_space<vmem>>, vector<1x128xf32>
    %4 = vector.broadcast %3 : vector<1x128xf32> to vector<8x128xf32>
    %5 = arith.addf %2, %4 : vector<8x128xf32>
    %cst_5 = arith.constant 0.000000e+00 : f32
    %6 = vector.broadcast %cst_5 : f32 to vector<8x128xf32>
    %7 = arith.maximumf %5, %6 : vector<8x128xf32>
    %8 = arith.truncf %7 : vector<8x128xf32> to vector<8x128xbf16>
    %c0_6 = arith.constant 0 : index
    %c0_7 = arith.constant 0 : index
    %9 = vector.load %arg4[%c0_6, %c0_7] : memref<128x128xbf16, #tpu.memory_space<vmem>>, vector<128x128xbf16>
    %cst_8 = arith.constant dense<0.000000e+00> : vector<8x128xf32>
    %10 = tpu.matmul %8, %9, %cst_8 {dimension_numbers = #tpu.dot_dimension_numbers<[1], [0], [0], [1], [0, 0, 1, 1], [], []>} : vector<8x128xbf16>, vector<128x128xbf16>, vector<8x128xf32> -> vector<8x128xf32>
    %c0_9 = arith.constant 0 : index
    %c0_10 = arith.constant 0 : index
    %11 = vector.load %arg5[%c0_9, %c0_10] : memref<1x128xf32, #tpu.memory_space<vmem>>, vector<1x128xf32>
    %12 = vector.broadcast %11 : vector<1x128xf32> to vector<8x128xf32>
    %13 = arith.addf %10, %12 : vector<8x128xf32>
    %cst_11 = arith.constant 0.000000e+00 : f32
    %14 = vector.broadcast %cst_11 : f32 to vector<8x128xf32>
    %15 = arith.maximumf %13, %14 : vector<8x128xf32>
    %16 = arith.truncf %15 : vector<8x128xf32> to vector<8x128xbf16>
    %c0_12 = arith.constant 0 : index
    %c0_13 = arith.constant 0 : index
    %17 = vector.load %arg6[%c0_12, %c0_13] : memref<128x128xbf16, #tpu.memory_space<vmem>>, vector<128x128xbf16>
    %cst_14 = arith.constant dense<0.000000e+00> : vector<8x128xf32>
    %18 = tpu.matmul %16, %17, %cst_14 {dimension_numbers = #tpu.dot_dimension_numbers<[1], [0], [0], [1], [0, 0, 1, 1], [], []>} : vector<8x128xbf16>, vector<128x128xbf16>, vector<8x128xf32> -> vector<8x128xf32>
    %c0_15 = arith.constant 0 : index
    %c0_16 = arith.constant 0 : index
    %19 = vector.load %arg7[%c0_15, %c0_16] : memref<1x128xf32, #tpu.memory_space<vmem>>, vector<1x128xf32>
    %20 = vector.broadcast %19 : vector<1x128xf32> to vector<8x128xf32>
    %21 = arith.addf %18, %20 : vector<8x128xf32>
    %cst_17 = arith.constant 0.000000e+00 : f32
    %22 = vector.broadcast %cst_17 : f32 to vector<8x128xf32>
    %23 = arith.maximumf %21, %22 : vector<8x128xf32>
    %24 = arith.truncf %23 : vector<8x128xf32> to vector<8x128xbf16>
    %c0_18 = arith.constant 0 : index
    %c0_19 = arith.constant 0 : index
    %25 = vector.load %arg8[%c0_18, %c0_19] : memref<128x128xbf16, #tpu.memory_space<vmem>>, vector<128x128xbf16>
    %cst_20 = arith.constant dense<0.000000e+00> : vector<8x128xf32>
    %26 = tpu.matmul %24, %25, %cst_20 {dimension_numbers = #tpu.dot_dimension_numbers<[1], [0], [0], [1], [0, 0, 1, 1], [], []>} : vector<8x128xbf16>, vector<128x128xbf16>, vector<8x128xf32> -> vector<8x128xf32>
    %c0_21 = arith.constant 0 : index
    %c0_22 = arith.constant 0 : index
    %27 = vector.load %arg9[%c0_21, %c0_22] : memref<1x128xf32, #tpu.memory_space<vmem>>, vector<1x128xf32>
    %28 = vector.broadcast %27 : vector<1x128xf32> to vector<8x128xf32>
    %29 = arith.addf %26, %28 : vector<8x128xf32>
    %cst_23 = arith.constant 0.000000e+00 : f32
    %30 = vector.broadcast %cst_23 : f32 to vector<8x128xf32>
    %31 = arith.maximumf %29, %30 : vector<8x128xf32>
    %32 = arith.truncf %31 : vector<8x128xf32> to vector<8x128xbf16>
    %c0_24 = arith.constant 0 : index
    %c0_25 = arith.constant 0 : index
    %33 = vector.load %arg10[%c0_24, %c0_25] : memref<128x128xbf16, #tpu.memory_space<vmem>>, vector<128x128xbf16>
    %cst_26 = arith.constant dense<0.000000e+00> : vector<8x128xf32>
    %34 = tpu.matmul %32, %33, %cst_26 {dimension_numbers = #tpu.dot_dimension_numbers<[1], [0], [0], [1], [0, 0, 1, 1], [], []>} : vector<8x128xbf16>, vector<128x128xbf16>, vector<8x128xf32> -> vector<8x128xf32>
    %c0_27 = arith.constant 0 : index
    %c0_28 = arith.constant 0 : index
    %35 = vector.load %arg11[%c0_27, %c0_28] : memref<1x128xf32, #tpu.memory_space<vmem>>, vector<1x128xf32>
    %36 = vector.broadcast %35 : vector<1x128xf32> to vector<8x128xf32>
    %37 = arith.addf %34, %36 : vector<8x128xf32>
    %c0_29 = arith.constant 0 : index
    %c0_30 = arith.constant 0 : index
    %38 = vector.load %arg12[%c0_29, %c0_30] : memref<8x128xf32, #tpu.memory_space<vmem>>, vector<8x128xf32>
    tpu.vector_store %arg12[%c0_29, %c0_30], %37 {strides = array<i32>} : memref<8x128xf32, #tpu.memory_space<vmem>>, vector<8x128xf32>,
    return
  }
  func.func @transform_0(%arg0: i32) -> (i32, i32) {
    %c0_i32 = arith.constant 0 : i32
    %c0_i32_0 = arith.constant 0 : i32
    return %arg0, %c0_i32 : i32, i32
  }
  func.func @transform_1(%arg0: i32) -> (i32, i32) {
    %c0_i32 = arith.constant 0 : i32
    %c0_i32_0 = arith.constant 0 : i32
    %c0_i32_1 = arith.constant 0 : i32
    return %c0_i32, %c0_i32_0 : i32, i32
  }
  func.func @transform_2(%arg0: i32) -> (i32, i32) {
    %c0_i32 = arith.constant 0 : i32
    %c0_i32_0 = arith.constant 0 : i32
    %c0_i32_1 = arith.constant 0 : i32
    return %c0_i32, %c0_i32_0 : i32, i32
  }
  func.func @transform_3(%arg0: i32) -> (i32, i32) {
    %c0_i32 = arith.constant 0 : i32
    %c0_i32_0 = arith.constant 0 : i32
    %c0_i32_1 = arith.constant 0 : i32
    return %c0_i32, %c0_i32_0 : i32, i32
  }
  func.func @transform_4(%arg0: i32) -> (i32, i32) {
    %c0_i32 = arith.constant 0 : i32
    %c0_i32_0 = arith.constant 0 : i32
    %c0_i32_1 = arith.constant 0 : i32
    return %c0_i32, %c0_i32_0 : i32, i32
  }
  func.func @transform_5(%arg0: i32) -> (i32, i32) {
    %c0_i32 = arith.constant 0 : i32
    %c0_i32_0 = arith.constant 0 : i32
    %c0_i32_1 = arith.constant 0 : i32
    return %c0_i32, %c0_i32_0 : i32, i32
  }
  func.func @transform_6(%arg0: i32) -> (i32, i32) {
    %c0_i32 = arith.constant 0 : i32
    %c0_i32_0 = arith.constant 0 : i32
    %c0_i32_1 = arith.constant 0 : i32
    return %c0_i32, %c0_i32_0 : i32, i32
  }
  func.func @transform_7(%arg0: i32) -> (i32, i32) {
    %c0_i32 = arith.constant 0 : i32
    %c0_i32_0 = arith.constant 0 : i32
    %c0_i32_1 = arith.constant 0 : i32
    return %c0_i32, %c0_i32_0 : i32, i32
  }
  func.func @transform_8(%arg0: i32) -> (i32, i32) {
    %c0_i32 = arith.constant 0 : i32
    %c0_i32_0 = arith.constant 0 : i32
    %c0_i32_1 = arith.constant 0 : i32
    return %c0_i32, %c0_i32_0 : i32, i32
  }
  func.func @transform_9(%arg0: i32) -> (i32, i32) {
    %c0_i32 = arith.constant 0 : i32
    %c0_i32_0 = arith.constant 0 : i32
    %c0_i32_1 = arith.constant 0 : i32
    return %c0_i32, %c0_i32_0 : i32, i32
  }
  func.func @transform_10(%arg0: i32) -> (i32, i32) {
    %c0_i32 = arith.constant 0 : i32
    %c0_i32_0 = arith.constant 0 : i32
    %c0_i32_1 = arith.constant 0 : i32
    return %c0_i32, %c0_i32_0 : i32, i32
  }
  func.func @transform_11(%arg0: i32) -> (i32, i32) {
    %c0_i32 = arith.constant 0 : i32
    %c0_i32_0 = arith.constant 0 : i32
    return %arg0, %c0_i32 : i32, i32
  }
}

</mosaic_0001>

<bundles_post_ra>
// kernel: tpu_custom_call.1
= control target key start
LH: loop header
LB: loop body
LE: loop exit
PB: predicated region body
PF: predicated region fallthrough
CT: control target
= control target key end

     0   :  { %16 = vsyncpa [#allocation3], 0  ;;  %s1343_s0 = inlined_call_operand.hbm [shape: bf16[8,128], index: 0, kind: input, shape index: {}]   ;;  %s1344_s1 = inlined_call_operand.hbm [shape: bf16[128,128], index: 1, kind: input, shape index: {}]   ;;  %s1345_s2 = inlined_call_operand.vmem [shape: f32[1,128], index: 2, kind: input, shape index: {}]   ;;  %s1346_s3 = inlined_call_operand.hbm [shape: bf16[128,128], index: 3, kind: input, shape index: {}]   ;;  %s1347_s4 = inlined_call_operand.vmem [shape: f32[1,128], index: 4, kind: input, shape index: {}]   ;;  %s1348_s5 = inlined_call_operand.hbm [shape: bf16[128,128], index: 5, kind: input, shape index: {}]   ;;  %s1349_s6 = inlined_call_operand.vmem [shape: f32[1,128], index: 6, kind: input, shape index: {}]   ;;  %s1350_s7 = inlined_call_operand.hbm [shape: bf16[128,128], index: 7, kind: input, shape index: {}]   ;;  %s1351_s8 = inlined_call_operand.vmem [shape: f32[1,128], index: 8, kind: input, shape index: {}]   ;;  %s1352_s9 = inlined_call_operand.hbm [shape: bf16[128,128], index: 9, kind: input, shape index: {}]   ;;  %s1353_s10 = inlined_call_operand.vmem [shape: f32[1,128], index: 10, kind: input, shape index: {}]   ;;  %s1354_s11 = inlined_call_operand.hbm [shape: f32[8,128], index: 11, kind: output, shape index: {}]  }
   0x1   :  { %17 = vsyncpa [#allocation6], 0 }
   0x2   :  { %18 = vsyncpa [#allocation9], 0 }
   0x3   :  { %19 = vsyncpa [#allocation12], 0 }
   0x4   :  { %20 = vsyncpa [#allocation4], 0  ;;  %s1108_s17 = smov [#allocation5]   ;;  %s944_s21 = scalar_lea.hbm %s1344_s1, 1024 }
   0x5   :  { %s36_s18 = sshll.u32 %s1108_s17, 4  ;;  %p945_p0 = scmp.ne.s32.totalorder %s1344_s1, %s944_s21  ;;  %s37_s18 = int_to_ptr.vmem [resolvable:$true] %s36_s18 }
   0x6   :  { %p948_p1 = scmp.lt.u32.totalorder %s944_s21, %s1344_s1 }
   0x8   :  { %p950_p2 = pnand %p948_p1, %p945_p0 }
   0xa   :  { %953 = shalt.err (!%p950_p2)
}
   0xb   :  { %s954_s26 = scalar_lea.vmem %s37_s18, 1024  ;;  %p959_p4 = scmp.lt.s32.totalorder %s37_s18, %s37_s18 }
   0xc   :  { %p955_p3 = scmp.ne.s32.totalorder %s37_s18, %s954_s26  ;;  %p960_p5 = scmp.lt.s32.totalorder %s954_s26, %s954_s26 }
   0xe   :  { %p961_p6 = por %p960_p5, %p959_p4 }
  0x10   :  { %p962_p7 = pnand %p961_p6, %p955_p3 }
  0x12   :  { %965 = shalt.err (!%p962_p7)
}
  0x13   :  { %s1109_s27 = smov 64   ;;  %s1110_s28 = smov 4  }
  0x14   :  { %42 = dma.hbm_to_vmem [thread:$0]  %s1344_s1, 1024, %s37_s18, [#allocation6], %s1109_s27, %s1109_s27, %s1110_s28  }
  0x15   :  { %s1111_s12 = smov [#allocation8]   ;;  %s1112_s14 = smov [#allocation2]  }
  0x16   :  { %s64_s13 = sshll.u32 %s1111_s12, 4  ;;  %s27_s15 = sshll.u32 %s1112_s14, 4  ;;  %s65_s13 = int_to_ptr.vmem [resolvable:$true] %s64_s13  ;;  %s28_s15 = int_to_ptr.vmem [resolvable:$true] %s27_s15 }
  0x17   :  { %s966_s19 = scalar_lea.hbm %s1348_s5, 1024 }
  0x18   :  { %p967_p8 = scmp.ne.s32.totalorder %s1348_s5, %s966_s19  ;;  %p970_p9 = scmp.lt.u32.totalorder %s966_s19, %s1348_s5 }
  0x1a   :  { %p972_p10 = pnand %p970_p9, %p967_p8 }
  0x1c   :  { %975 = shalt.err (!%p972_p10)
}
  0x1d   :  { %s976_s1 = scalar_lea.vmem %s65_s13, 1024  ;;  %p981_p12 = scmp.lt.s32.totalorder %s65_s13, %s65_s13 }
  0x1e   :  { %p977_p11 = scmp.ne.s32.totalorder %s65_s13, %s976_s1  ;;  %p982_p13 = scmp.lt.s32.totalorder %s976_s1, %s976_s1 }
  0x20   :  { %p983_p0 = por %p982_p13, %p981_p12 }
  0x22   :  { %p984_p1 = pnand %p983_p0, %p977_p11 }
  0x24   :  { %987 = shalt.err (!%p984_p1)
}
  0x25   :  { %70 = dma.hbm_to_vmem [thread:$0]  %s1348_s5, 1024, %s65_s13, [#allocation9], %s1109_s27, %s1109_s27, %s1110_s28  }
  0x26   :  { %s988_s29 = scalar_lea.hbm %s1343_s0, 64 }
  0x27   :  { %p989_p2 = scmp.ne.s32.totalorder %s1343_s0, %s988_s29  ;;  %p992_p3 = scmp.lt.u32.totalorder %s988_s29, %s1343_s0 }
  0x29   :  { %p994_p4 = pnand %p992_p3, %p989_p2 }
  0x2b   :  { %997 = shalt.err (!%p994_p4)
}
  0x2c   :  { %s998_s17 = scalar_lea.vmem %s28_s15, 64  ;;  %p1003_p6 = scmp.lt.s32.totalorder %s28_s15, %s28_s15 }
  0x2d   :  { %p999_p5 = scmp.ne.s32.totalorder %s28_s15, %s998_s17  ;;  %p1004_p7 = scmp.lt.s32.totalorder %s998_s17, %s998_s17 }
  0x2f   :  { %p1005_p8 = por %p1004_p7, %p1003_p6 }
  0x31   :  { %p1006_p9 = pnand %p1005_p8, %p999_p5 }
  0x33   :  { %1009 = shalt.err (!%p1006_p9)
}
  0x34   :  { %30 = dma.hbm_to_vmem [thread:$0]  %s1343_s0, 64, %s28_s15, [#allocation3]  }
  0x35   :  { %s1113_s19 = smov [#allocation7]   ;;  %s1114_s21 = smov [#allocation10]  }
  0x36   :  { %s50_s20 = sshll.u32 %s1113_s19, 4  ;;  %s78_s22 = sshll.u32 %s1114_s21, 4  ;;  %s51_s20 = int_to_ptr.vmem [resolvable:$true] %s50_s20  ;;  %s79_s22 = int_to_ptr.vmem [resolvable:$true] %s78_s22 }
  0x37   :  { %s1010_s18 = scalar_lea.hbm %s1346_s3, 1024 }
  0x38   :  { %p1011_p10 = scmp.ne.s32.totalorder %s1346_s3, %s1010_s18  ;;  %p1014_p11 = scmp.lt.u32.totalorder %s1010_s18, %s1346_s3 }
  0x3a   :  { %p1016_p12 = pnand %p1014_p11, %p1011_p10 }
  0x3c   :  { %1019 = shalt.err (!%p1016_p12)
}
  0x3d   :  { %s1020_s0 = scalar_lea.vmem %s51_s20, 1024  ;;  %p1025_p0 = scmp.lt.s32.totalorder %s51_s20, %s51_s20 }
  0x3e   :  { %p1021_p13 = scmp.ne.s32.totalorder %s51_s20, %s1020_s0  ;;  %p1026_p1 = scmp.lt.s32.totalorder %s1020_s0, %s1020_s0 }
  0x40   :  { %p1027_p2 = por %p1026_p1, %p1025_p0 }
  0x42   :  { %p1028_p3 = pnand %p1027_p2, %p1021_p13 }
  0x44   :  { %1031 = shalt.err (!%p1028_p3)
}
  0x45   :  { %56 = dma.hbm_to_vmem [thread:$0]  %s1346_s3, 1024, %s51_s20, [#allocation6], %s1109_s27, %s1109_s27, %s1110_s28  }
  0x46   :  { %s1032_s16 = scalar_lea.hbm %s1350_s7, 1024 }
  0x47   :  { %p1033_p4 = scmp.ne.s32.totalorder %s1350_s7, %s1032_s16  ;;  %p1036_p5 = scmp.lt.u32.totalorder %s1032_s16, %s1350_s7 }
  0x49   :  { %p1038_p6 = pnand %p1036_p5, %p1033_p4 }
  0x4b   :  { %1041 = shalt.err (!%p1038_p6)
}
  0x4c   :  { %s1042_s21 = scalar_lea.vmem %s79_s22, 1024  ;;  %p1047_p8 = scmp.lt.s32.totalorder %s79_s22, %s79_s22 }
  0x4d   :  { %p1043_p7 = scmp.ne.s32.totalorder %s79_s22, %s1042_s21  ;;  %p1048_p9 = scmp.lt.s32.totalorder %s1042_s21, %s1042_s21 }
  0x4f   :  { %p1049_p10 = por %p1048_p9, %p1047_p8 }
  0x51   :  { %p1050_p11 = pnand %p1049_p10, %p1043_p7 }
  0x53   :  { %1053 = shalt.err (!%p1050_p11)
}
  0x54   :  { %84 = dma.hbm_to_vmem [thread:$0]  %s1350_s7, 1024, %s79_s22, [#allocation9], %s1109_s27, %s1109_s27, %s1110_s28  }
  0x55   :  { %s1115_s23 = smov [#allocation11]   ;;  %s1054_s25 = scalar_lea.hbm %s1352_s9, 1024 }
  0x56   :  { %s92_s1 = sshll.u32 %s1115_s23, 4  ;;  %p1055_p12 = scmp.ne.s32.totalorder %s1352_s9, %s1054_s25  ;;  %s93_s1 = int_to_ptr.vmem [resolvable:$true] %s92_s1 }
  0x57   :  { %p1058_p13 = scmp.lt.u32.totalorder %s1054_s25, %s1352_s9 }
  0x59   :  { %p1060_p0 = pnand %p1058_p13, %p1055_p12 }
  0x5b   :  { %1063 = shalt.err (!%p1060_p0)
}
  0x5c   :  { %s1064_s30 = scalar_lea.vmem %s93_s1, 1024  ;;  %p1069_p2 = scmp.lt.s32.totalorder %s93_s1, %s93_s1 }
  0x5d   :  { %p1065_p1 = scmp.ne.s32.totalorder %s93_s1, %s1064_s30  ;;  %p1070_p3 = scmp.lt.s32.totalorder %s1064_s30, %s1064_s30 }
  0x5f   :  { %p1071_p4 = por %p1070_p3, %p1069_p2 }
  0x61   :  { %p1072_p5 = pnand %p1071_p4, %p1065_p1 }
  0x63   :  { %1075 = shalt.err (!%p1072_p5)
}
  0x64   :  { %98 = dma.hbm_to_vmem [thread:$0]  %s1352_s9, 1024, %s93_s1, [#allocation12], %s1109_s27, %s1109_s27, %s1110_s28  }
  0x65   :  { %1098 = dma.done.wait [#allocation3], 64  }
  0x66   :  { %1099 = vsyncadd [#allocation3], 4294967232 }
  0x67   :  { %1100 = dma.done.wait [#allocation6], 2048  }
  0x68   :  { %1101 = vsyncadd [#allocation6], 4294965248 }
  0x69   :  { %1102 = dma.done.wait [#allocation9], 2048  }
  0x6a   :  { %1103 = vsyncadd [#allocation9], 4294965248 }
  0x6b   :  { %1104 = dma.done.wait [#allocation12], 1024  }
  0x6c   :  { %1105 = vsyncadd [#allocation12], 4294966272  ;;  %v1116_v0 = vmov 0.0   ;;  %vm1117_vm0 = vmmov 0   ;;  %v904_v1 = vld [vmem:[#allocation5] sm:$0xff]   ;;  %v905_v2 = vld [vmem:[#allocation5 + $0x8] sm:$0xff]  }
  0x6d   :  { %793 = vmatprep.subr.bf16.mxu0 %v1116_v0  ;;  %809 = vmatprep.mubr.msk.bf16.mxu0 %vm1117_vm0, %v1116_v0  ;;  %v906_v3 = vld [vmem:[#allocation5 + $0x10] sm:$0xff]   ;;  %v912_v4 = vld [vmem:[#allocation7] sm:$0xff]   ;;  %v907_v5 = vld [vmem:[#allocation5 + $0x18] sm:$0xff]   ;;  %s1118_s5 = smov [#allocation13]  }
  0x6e   :  { %813 = vmatprep.subr.bf16.mxu1 %v1116_v0  ;;  %829 = vmatprep.mubr.msk.bf16.mxu1 %vm1117_vm0, %v1116_v0  ;;  %v913_v6 = vld [vmem:[#allocation7 + $0x8] sm:$0xff]   ;;  %v908_v7 = vld [vmem:[#allocation5 + $0x20] sm:$0xff]   ;;  %v914_v8 = vld [vmem:[#allocation7 + $0x10] sm:$0xff]   ;;  %s691_s13 = sshll.u32 %s1118_s5, 4  ;;  %s692_s13 = int_to_ptr.vmem [resolvable:$true] %s691_s13 }
  0x6f   :  { %794 = vmatpush3.bf16.msra.mxu0 %v904_v1  ;;  %814 = vmatpush3.bf16.msra.mxu1 %v912_v4  ;;  %v909_v9 = vld [vmem:[#allocation5 + $0x28] sm:$0xff]   ;;  %v915_v10 = vld [vmem:[#allocation7 + $0x18] sm:$0xff]   ;;  %v910_v11 = vld [vmem:[#allocation5 + $0x30] sm:$0xff]   ;;  %p1081_p7 = scmp.lt.s32.totalorder %s692_s13, %s692_s13 }
  0x70   :  { %795 = vmatprep.subr.bf16.mxu0 %v1116_v0  ;;  %815 = vmatprep.subr.bf16.mxu1 %v1116_v0  ;;  %v916_v12 = vld [vmem:[#allocation7 + $0x20] sm:$0xff]   ;;  %v911_v13 = vld [vmem:[#allocation5 + $0x38] sm:$0xff]   ;;  %v917_v14 = vld [vmem:[#allocation7 + $0x28] sm:$0xff]  }
  0x71   :  { %v120_v15 = vld [vmem:[#allocation2] sm:$0xf]  ;;  %v918_v16 = vld [vmem:[#allocation7 + $0x30] sm:$0xff]   ;;  %v920_v18 = vld [vmem:[#allocation8] sm:$0xff]  }
  0x72   :  { %v919_v17 = vld [vmem:[#allocation7 + $0x38] sm:$0xff]   ;;  %v921_v19 = vld [vmem:[#allocation8 + $0x8] sm:$0xff]   ;;  %v922_v20 = vld [vmem:[#allocation8 + $0x10] sm:$0xff]  }
  0x73   :  { %796 = vmatpush3.bf16.msra.mxu0 %v905_v2  ;;  %816 = vmatpush3.bf16.msra.mxu1 %v913_v6  ;;  %v923_v21 = vld [vmem:[#allocation8 + $0x18] sm:$0xff]   ;;  %v924_v22 = vld [vmem:[#allocation8 + $0x20] sm:$0xff]   ;;  %v925_v23 = vld [vmem:[#allocation8 + $0x28] sm:$0xff]  }
  0x74   :  { %797 = vmatprep.subr.bf16.mxu0 %v1116_v0  ;;  %817 = vmatprep.subr.bf16.mxu1 %v1116_v0  ;;  %v703_v24 = vld [vmem:[%s1345_s2] ss:$0 sm:$0xff]  ;;  %v926_v32 = vld [vmem:[#allocation8 + $0x30] sm:$0xff]   ;;  %v928_v34 = vld [vmem:[#allocation10] sm:$0xff]  }
  0x75   :  { %v927_v33 = vld [vmem:[#allocation8 + $0x38] sm:$0xff]   ;;  %v929_v35 = vld [vmem:[#allocation10 + $0x8] sm:$0xff]   ;;  %v930_v36 = vld [vmem:[#allocation10 + $0x10] sm:$0xff]  }
  0x76   :  { %v931_v37 = vld [vmem:[#allocation10 + $0x18] sm:$0xff]   ;;  %v932_v38 = vld [vmem:[#allocation10 + $0x20] sm:$0xff]   ;;  %v933_v39 = vld [vmem:[#allocation10 + $0x28] sm:$0xff]  }
  0x77   :  { %798 = vmatpush3.bf16.msra.mxu0 %v906_v3  ;;  %818 = vmatpush3.bf16.msra.mxu1 %v914_v8  ;;  %v712_v40 = vld [vmem:[%s1347_s4] ss:$0 sm:$0xff]  ;;  %v934_v48 = vld [vmem:[#allocation10 + $0x30] sm:$0xff]   ;;  %v936_v50 = vld [vmem:[#allocation11] sm:$0xff]  }
  0x78   :  { %799 = vmatprep.subr.bf16.mxu0 %v1116_v0  ;;  %819 = vmatprep.subr.bf16.mxu1 %v1116_v0  ;;  %v935_v49 = vld [vmem:[#allocation10 + $0x38] sm:$0xff]   ;;  %v937_v51 = vld [vmem:[#allocation11 + $0x8] sm:$0xff]   ;;  %v938_v52 = vld [vmem:[#allocation11 + $0x10] sm:$0xff]  }
  0x79   :  { %v939_v53 = vld [vmem:[#allocation11 + $0x18] sm:$0xff]   ;;  %v940_v54 = vld [vmem:[#allocation11 + $0x20] sm:$0xff]   ;;  %v941_v55 = vld [vmem:[#allocation11 + $0x28] sm:$0xff]  }
  0x7a   :  { %v721_v56 = vld [vmem:[%s1349_s6] ss:$0 sm:$0xff]  ;;  %v942_v1 = vld [vmem:[#allocation11 + $0x30] sm:$0xff]  }
  0x7b   :  { %800 = vmatpush3.bf16.msra.mxu0 %v907_v5  ;;  %820 = vmatpush3.bf16.msra.mxu1 %v915_v10  ;;  %v943_v2 = vld [vmem:[#allocation11 + $0x38] sm:$0xff]  }
  0x7c   :  { %801 = vmatprep.subr.bf16.mxu0 %v1116_v0  ;;  %821 = vmatprep.subr.bf16.mxu1 %v1116_v0  ;;  %v730_v3 = vld [vmem:[%s1351_s8] ss:$0 sm:$0xff]  ;;  %s1076_s8 = scalar_lea.vmem %s692_s13, 128 }
  0x7d   :  { %p1077_p6 = scmp.ne.s32.totalorder %s692_s13, %s1076_s8  ;;  %p1082_p8 = scmp.lt.s32.totalorder %s1076_s8, %s1076_s8 }
  0x7f   :  { %802 = vmatpush3.bf16.msra.mxu0 %v908_v7  ;;  %822 = vmatpush3.bf16.msra.mxu1 %v916_v12  ;;  %p1083_p9 = por %p1082_p8, %p1081_p7 }
  0x80   :  { %803 = vmatprep.subr.bf16.mxu0 %v1116_v0  ;;  %823 = vmatprep.subr.bf16.mxu1 %v1116_v0 }
  0x81   :  { %p1084_p10 = pnand %p1083_p9, %p1077_p6 }
  0x83   :  { %804 = vmatpush3.bf16.msra.mxu0 %v909_v9  ;;  %824 = vmatpush3.bf16.msra.mxu1 %v917_v14 }
  0x84   :  { %805 = vmatprep.subr.bf16.mxu0 %v1116_v0  ;;  %825 = vmatprep.subr.bf16.mxu1 %v1116_v0 }
  0x87   :  { %806 = vmatpush3.bf16.msra.mxu0 %v910_v11  ;;  %826 = vmatpush3.bf16.msra.mxu1 %v918_v16  ;;  %v739_v11 = vld [vmem:[%s1353_s10] ss:$0 sm:$0xff] }
  0x88   :  { %807 = vmatprep.subr.bf16.mxu0 %v1116_v0  ;;  %827 = vmatprep.subr.bf16.mxu1 %v1116_v0 }
  0x8b   :  { %808 = vmatpush3.bf16.msra.mxu0 %v911_v13  ;;  %828 = vmatpush3.bf16.msra.mxu1 %v919_v17 }
  0x8c   :  { %833 = vmatprep.subr.bf16.mxu0 %v1116_v0  ;;  %853 = vmatprep.subr.bf16.mxu1 %v1116_v0 }
  0x8e   :  { %810 = vmatmul.mubr.bf16.vlgmr.msra.gmra.mrb[0].mxu0 %v120_v15 }
  0x8f   :  { %849 = vmatprep.mubr.msk.bf16.mxu0 %vm1117_vm0, %v1116_v0  ;;  %834 = vmatpush3.bf16.msra.mxu0 %v920_v18 }
  0x90   :  { %835 = vmatprep.subr.bf16.mxu0 %v1116_v0 }
  0x93   :  { %836 = vmatpush3.bf16.msra.mxu0 %v921_v19 }
  0x94   :  { %837 = vmatprep.subr.bf16.mxu0 %v1116_v0 }
  0x97   :  { %838 = vmatpush3.bf16.msra.mxu0 %v922_v20 }
  0x98   :  { %839 = vmatprep.subr.bf16.mxu0 %v1116_v0 }
  0x9b   :  { %840 = vmatpush3.bf16.msra.mxu0 %v923_v21 }
  0x9c   :  { %841 = vmatprep.subr.bf16.mxu0 %v1116_v0 }
  0x9f   :  { %842 = vmatpush3.bf16.msra.mxu0 %v924_v22 }
  0xa0   :  { %843 = vmatprep.subr.bf16.mxu0 %v1116_v0 }
  0xa3   :  { %844 = vmatpush3.bf16.msra.mxu0 %v925_v23 }
  0xa4   :  { %845 = vmatprep.subr.bf16.mxu0 %v1116_v0 }
  0xa7   :  { %846 = vmatpush3.bf16.msra.mxu0 %v926_v32 }
  0xa8   :  { %847 = vmatprep.subr.bf16.mxu0 %v1116_v0 }
  0xab   :  { %848 = vmatpush3.bf16.msra.mxu0 %v927_v33 }
  0xac   :  { %873 = vmatprep.subr.bf16.mxu0 %v1116_v0 }
 0x161   :  { %v226_v25 = vpop.f32.mrb[0].mxu0 }
 0x162   :  { %v227_v26 = vadd.f32 %v703_v24, %v226_v25  ;;  %v811_v27 = vpop.f32.mrb[1].mxu0 }
 0x163   :  { %v229_v28 = vpop.f32.mrb[2].mxu0 }
 0x164   :  { %v232_v29 = vmax.f32 %v227_v26, 0.0  ;;  %v812_v30 = vpop.f32.mrb[3].mxu0 }
 0x166   :  { %v233_v31 = vpack.c.bf16 %v232_v29, %v232_v29 }
 0x168   :  { %830 = vmatmul.mubr.bf16.vlgmr.msra.gmra.mrb[0].mxu1 %v233_v31 }
 0x169   :  { %869 = vmatprep.mubr.msk.bf16.mxu1 %vm1117_vm0, %v1116_v0  ;;  %854 = vmatpush3.bf16.msra.mxu1 %v928_v34 }
 0x16a   :  { %855 = vmatprep.subr.bf16.mxu1 %v1116_v0 }
 0x16d   :  { %856 = vmatpush3.bf16.msra.mxu1 %v929_v35 }
 0x16e   :  { %857 = vmatprep.subr.bf16.mxu1 %v1116_v0 }
 0x171   :  { %858 = vmatpush3.bf16.msra.mxu1 %v930_v36 }
 0x172   :  { %859 = vmatprep.subr.bf16.mxu1 %v1116_v0 }
 0x175   :  { %860 = vmatpush3.bf16.msra.mxu1 %v931_v37 }
 0x176   :  { %861 = vmatprep.subr.bf16.mxu1 %v1116_v0 }
 0x179   :  { %862 = vmatpush3.bf16.msra.mxu1 %v932_v38 }
 0x17a   :  { %863 = vmatprep.subr.bf16.mxu1 %v1116_v0 }
 0x17d   :  { %864 = vmatpush3.bf16.msra.mxu1 %v933_v39 }
 0x17e   :  { %865 = vmatprep.subr.bf16.mxu1 %v1116_v0 }
 0x181   :  { %866 = vmatpush3.bf16.msra.mxu1 %v934_v48 }
 0x182   :  { %867 = vmatprep.subr.bf16.mxu1 %v1116_v0 }
 0x185   :  { %868 = vmatpush3.bf16.msra.mxu1 %v935_v49 }
 0x23b   :  { %v339_v41 = vpop.f32.mrb[0].mxu1 }
 0x23c   :  { %v340_v42 = vadd.f32 %v712_v40, %v339_v41  ;;  %v831_v43 = vpop.f32.mrb[1].mxu1 }
 0x23d   :  { %v342_v44 = vpop.f32.mrb[2].mxu1 }
 0x23e   :  { %v345_v45 = vmax.f32 %v340_v42, 0.0  ;;  %v832_v46 = vpop.f32.mrb[3].mxu1 }
 0x240   :  { %v346_v47 = vpack.c.bf16 %v345_v45, %v345_v45 }
 0x242   :  { %850 = vmatmul.mubr.bf16.vlgmr.msra.gmra.mrb[4].mxu0 %v346_v47 }
 0x243   :  { %889 = vmatprep.mubr.msk.bf16.mxu0 %vm1117_vm0, %v1116_v0  ;;  %874 = vmatpush3.bf16.msra.mxu0 %v936_v50 }
 0x244   :  { %875 = vmatprep.subr.bf16.mxu0 %v1116_v0 }
 0x247   :  { %876 = vmatpush3.bf16.msra.mxu0 %v937_v51 }
 0x248   :  { %877 = vmatprep.subr.bf16.mxu0 %v1116_v0 }
 0x24b   :  { %878 = vmatpush3.bf16.msra.mxu0 %v938_v52 }
 0x24c   :  { %879 = vmatprep.subr.bf16.mxu0 %v1116_v0 }
 0x24f   :  { %880 = vmatpush3.bf16.msra.mxu0 %v939_v53 }
 0x250   :  { %881 = vmatprep.subr.bf16.mxu0 %v1116_v0 }
 0x253   :  { %882 = vmatpush3.bf16.msra.mxu0 %v940_v54 }
 0x254   :  { %883 = vmatprep.subr.bf16.mxu0 %v1116_v0 }
 0x257   :  { %884 = vmatpush3.bf16.msra.mxu0 %v941_v55 }
 0x258   :  { %885 = vmatprep.subr.bf16.mxu0 %v1116_v0 }
 0x25b   :  { %886 = vmatpush3.bf16.msra.mxu0 %v942_v1 }
 0x25c   :  { %887 = vmatprep.subr.bf16.mxu0 %v1116_v0 }
 0x25f   :  { %888 = vmatpush3.bf16.msra.mxu0 %v943_v2 }
 0x315   :  { %v452_v57 = vpop.f32.mrb[4].mxu0 }
 0x316   :  { %v453_v58 = vadd.f32 %v721_v56, %v452_v57  ;;  %v851_v59 = vpop.f32.mrb[5].mxu0 }
 0x317   :  { %v455_v60 = vpop.f32.mrb[6].mxu0 }
 0x318   :  { %v458_v61 = vmax.f32 %v453_v58, 0.0  ;;  %v852_v62 = vpop.f32.mrb[7].mxu0 }
 0x31a   :  { %v459_v63 = vpack.c.bf16 %v458_v61, %v458_v61 }
 0x31c   :  { %870 = vmatmul.mubr.bf16.vlgmr.msra.gmra.mrb[4].mxu1 %v459_v63 }
 0x3ef   :  { %v565_v4 = vpop.f32.mrb[4].mxu1 }
 0x3f0   :  { %v566_v5 = vadd.f32 %v730_v3, %v565_v4  ;;  %v871_v6 = vpop.f32.mrb[5].mxu1 }
 0x3f1   :  { %v568_v7 = vpop.f32.mrb[6].mxu1 }
 0x3f2   :  { %v571_v8 = vmax.f32 %v566_v5, 0.0  ;;  %v872_v9 = vpop.f32.mrb[7].mxu1 }
 0x3f4   :  { %v572_v10 = vpack.c.bf16 %v571_v8, %v571_v8 }
 0x3f6   :  { %890 = vmatmul.mubr.bf16.vlgmr.msra.gmra.mrb[8].mxu0 %v572_v10 }
 0x4c9   :  { %v678_v0 = vpop.f32.mrb[8].mxu0 }
 0x4ca   :  { %v679_v12 = vadd.f32 %v739_v11, %v678_v0  ;;  %v891_v13 = vpop.f32.mrb[9].mxu0 }
 0x4cb   :  { %v681_v14 = vpop.f32.mrb[10].mxu0 }
 0x4cc   :  { %684 = vst [vmem:[#allocation13] sm:$0xff] %v679_v12  ;;  %v892_v15 = vpop.f32.mrb[11].mxu0 }
 0x4cd   :  { %1087 = shalt.err (!%p1084_p10)
}
 0x4ce   :  { %s1088_s10 = scalar_lea.hbm %s1354_s11, 128 }
 0x4cf   :  { %p1089_p11 = scmp.ne.s32.totalorder %s1354_s11, %s1088_s10  ;;  %p1092_p12 = scmp.lt.u32.totalorder %s1088_s10, %s1354_s11 }
 0x4d1   :  { %p1094_p13 = pnand %p1092_p12, %p1089_p11 }
 0x4d3   :  { %1097 = shalt.err (!%p1094_p13)
}
 0x4d4   :  { %694 = dma.vmem_to_hbm [thread:$0]  %s692_s13, 128, %s1354_s11, [#allocation4]  }
 0x4d5   :  { %1106 = dma.done.wait [#allocation4], 128  }
 0x4d6   :  { %1107 = vsyncadd [#allocation4], 4294967168 }
 0x4d7   :  { %698 = vsyncpa [#allocation3], 1 }
 0x4d8   :  { %699 = vsyncpa [#allocation6], 1 }
 0x4d9   :  { %700 = vsyncpa [#allocation9], 1 }
 0x4da   :  { %701 = vsyncpa [#allocation12], 1 }
 0x4db   :  { %702 = vsyncpa [#allocation4], 1 }

</bundles_post_ra>
